<compile_context>
chip_gen: v7x
topology: tpu7x:2x2x1
jax: 0.10.0
libtpu: 0.0.40
codegen_flags: <defaults>
</compile_context>

<pallas_src>
import functools

import jax
import jax.numpy as jnp
from jax import lax
from jax.experimental import pallas as pl
from jax.experimental.pallas import tpu as pltpu


def _lstm_linear_kernel(x_ref, w_ih_ref, w_hh_ref, b_ref, w_lin_ref, b_lin_ref,
                        out_ref, gx_sc, *, seq_len, hidden_size):
    T, H = seq_len, hidden_size
    B = out_ref.shape[0]

    # ---- One-shot input projection (off the serial recurrence path) ----
    # gates_x[t*B + b, :] = x[b, t, :] @ W_ih + (b_ih + b_hh), gate order [i, f, o, g].
    gx_sc[...] = jnp.dot(x_ref[...], w_ih_ref[...],
                         preferred_element_type=jnp.float32) + b_ref[...]

    # ---- Recurrence: h, c carried in vregs; per step only h @ W_hh (aligned 32x128) ----
    def step(t, carry):
        h, c = carry
        gates = jnp.dot(h, w_hh_ref[...],
                        preferred_element_type=jnp.float32)
        gates = gates + gx_sc[pl.ds(t * B, B), :]          # precomputed x-projection slice
        sfo = jax.nn.sigmoid(gates[:, 0:3 * H])            # contiguous [i|f|o] slab
        g_g = jnp.tanh(gates[:, 3 * H:4 * H])
        i_g = sfo[:, 0:H]
        f_g = sfo[:, H:2 * H]
        o_g = sfo[:, 2 * H:3 * H]
        c_new = f_g * c + i_g * g_g
        h_new = o_g * jnp.tanh(c_new)
        return h_new, c_new

    h0 = jnp.zeros((B, H), jnp.float32)
    c0 = jnp.zeros((B, H), jnp.float32)
    h_last, _ = lax.fori_loop(0, T, step, (h0, c0), unroll=True)

    # Dropout(eval) is identity; Linear(H -> 1) as VPU multiply + lane reduce.
    out = jnp.sum(h_last * w_lin_ref[...], axis=-1, keepdims=True) + b_lin_ref[...]
    out_ref[...] = out.astype(out_ref.dtype)


def pack_params(params):
    """Re-pack PyTorch-layout LSTM/Linear params into the kernel layout."""
    w_ih, w_hh = params["w_ih"], params["w_hh"]          # (F, 4H), (H, 4H), order [i,f,g,o]
    b = params["b_ih"] + params["b_hh"]                  # (4H,)
    H = w_hh.shape[0]

    def reorder(w):  # gate order [i, f, g, o] -> [i, f, o, g] along the 4H axis
        return jnp.concatenate(
            [w[..., 0:H], w[..., H:2 * H], w[..., 3 * H:4 * H], w[..., 2 * H:3 * H]],
            axis=-1)

    return {
        "w_ih": reorder(w_ih),                           # (F, 4H)
        "w_hh": reorder(w_hh),                           # (H, 4H)  aligned 32x128
        "b": reorder(b)[None, :],                        # (1, 4H)
        "w_lin_row": params["w_lin"].T,                  # (1, H) since O == 1
        "b_lin": params["b_lin"][None, :],               # (1, 1)
    }


def transfer_lstm_forward(x, params):
    """x: (B, T, F) float32, batch_first like nn.LSTM(batch_first=True)."""
    B, T, F = x.shape
    H = params["w_hh"].shape[0]
    O = params["w_lin"].shape[1]
    assert O == 1, "kernel specializes the final Linear to output_size=1 (module spec)"
    assert T >= 1

    packed = pack_params(params)
    # (B, T, F) -> time-major, flattened lane-dense (T*B, F): row t*B + b is x[b, t, :].
    x_flat = jnp.transpose(x, (1, 0, 2)).reshape(T * B, F)

    kernel = functools.partial(_lstm_linear_kernel, seq_len=T, hidden_size=H)

    return pl.pallas_call(
        kernel,
        out_shape=jax.ShapeDtypeStruct((B, O), jnp.float32),
        grid=(1,),
        in_specs=[
            pl.BlockSpec((T * B, F), lambda i: (0, 0)),        # x, time-major flat
            pl.BlockSpec((F, 4 * H), lambda i: (0, 0)),        # W_ih [i,f,o,g]
            pl.BlockSpec((H, 4 * H), lambda i: (0, 0)),        # W_hh [i,f,o,g]
            pl.BlockSpec((1, 4 * H), lambda i: (0, 0)),        # b_ih + b_hh
            pl.BlockSpec((1, H), lambda i: (0, 0)),            # W_lin row
            pl.BlockSpec((1, 1), lambda i: (0, 0)),            # b_lin
        ],
        out_specs=pl.BlockSpec((B, O), lambda i: (0, 0)),
        scratch_shapes=[
            pltpu.VMEM((T * B, 4 * H), jnp.float32),           # precomputed gates_x
        ],
        compiler_params=pltpu.CompilerParams(
            dimension_semantics=("arbitrary",)),
    )(x_flat, packed["w_ih"], packed["w_hh"], packed["b"],
      packed["w_lin_row"], packed["b_lin"])


def reference_forward(x, params):
    """Pure-JAX reference matching PyTorch nn.LSTM + Linear (eval-mode dropout) semantics."""
    B, T, F = x.shape
    H = params["w_hh"].shape[0]
    b = params["b_ih"] + params["b_hh"]

    def step(carry, x_t):
        h, c = carry
        gates = x_t @ params["w_ih"] + h @ params["w_hh"] + b
        i = jax.nn.sigmoid(gates[:, 0:H])
        f = jax.nn.sigmoid(gates[:, H:2 * H])
        g = jnp.tanh(gates[:, 2 * H:3 * H])
        o = jax.nn.sigmoid(gates[:, 3 * H:4 * H])
        c = f * c + i * g
        h = o * jnp.tanh(c)
        return (h, c), None

    h0 = jnp.zeros((B, H), jnp.float32)
    c0 = jnp.zeros((B, H), jnp.float32)
    (h_last, _), _ = jax.lax.scan(step, (h0, c0), jnp.transpose(x, (1, 0, 2)))
    return h_last @ params["w_lin"] + params["b_lin"]


def init_params(key, input_size, hidden_size, output_size):
    """Deterministic synthetic parameters (PyTorch-style uniform(-1/sqrt(H), 1/sqrt(H)))."""
    k = 1.0 / jnp.sqrt(jnp.float32(hidden_size))
    ks = jax.random.split(key, 6)
    # PyTorch stores weight_ih_l0 as (4H, F); we keep the transposed (F, 4H) layout,
    # gate order [i, f, g, o].
    w_ih = jax.random.uniform(ks[0], (input_size, 4 * hidden_size), jnp.float32, -k, k)
    w_hh = jax.random.uniform(ks[1], (hidden_size, 4 * hidden_size), jnp.float32, -k, k)
    b_ih = jax.random.uniform(ks[2], (4 * hidden_size,), jnp.float32, -k, k)
    b_hh = jax.random.uniform(ks[3], (4 * hidden_size,), jnp.float32, -k, k)
    w_lin = jax.random.uniform(ks[4], (hidden_size, output_size), jnp.float32, -k, k)
    b_lin = jax.random.uniform(ks[5], (output_size,), jnp.float32, -k, k)
    return {"w_ih": w_ih, "w_hh": w_hh, "b_ih": b_ih, "b_hh": b_hh,
            "w_lin": w_lin, "b_lin": b_lin}


if __name__ == "__main__":
    # Small shapes consistent with the module: batch=8, seq=8, features=16, hidden=32, output=1.
    B, T, F, H, O = 8, 8, 16, 32, 1

    key = jax.random.PRNGKey(0)
    k_x, k_p = jax.random.split(key)
    x = jax.random.normal(k_x, (B, T, F), jnp.float32)
    params = init_params(k_p, F, H, O)

    out = jax.block_until_ready(transfer_lstm_forward(x, params))
    ref = jax.block_until_ready(reference_forward(x, params))

    assert out.shape == (B, O)
    assert jnp.allclose(out, ref, atol=1e-4, rtol=1e-4), (
        f"mismatch: max abs err {jnp.max(jnp.abs(out - ref))}")

    print("KERNEL_OK")
</pallas_src>

<mosaic_0001>
module attributes {stable_mosaic.version = 11 : i64} {
  func.func @_lstm_linear_kernel(%arg0: i32, %arg1: memref<64x16xf32, #tpu.memory_space<vmem>>, %arg2: memref<16x128xf32, #tpu.memory_space<vmem>>, %arg3: memref<32x128xf32, #tpu.memory_space<vmem>>, %arg4: memref<1x128xf32, #tpu.memory_space<vmem>>, %arg5: memref<1x32xf32, #tpu.memory_space<vmem>>, %arg6: memref<1x1xf32, #tpu.memory_space<vmem>>, %arg7: memref<8x1xf32, #tpu.memory_space<vmem>>, %arg8: memref<64x128xf32, #tpu.memory_space<vmem>>) attributes {dimension_semantics = [#tpu.dimension_semantics<arbitrary>], iteration_bounds = array<i64: 1>, scalar_prefetch = 0 : i64, scratch_operands = 1 : i64, tpu.core_type = #tpu.core_type<tc>, window_params = [{pipeline_mode = #tpu.pipeline_mode<synchronous>, transform_indices = @transform_0, window_bounds = array<i64: 64, 16>}, {pipeline_mode = #tpu.pipeline_mode<synchronous>, transform_indices = @transform_1, window_bounds = array<i64: 16, 128>}, {pipeline_mode = #tpu.pipeline_mode<synchronous>, transform_indices = @transform_2, window_bounds = array<i64: 32, 128>}, {pipeline_mode = #tpu.pipeline_mode<synchronous>, transform_indices = @transform_3, window_bounds = array<i64: 1, 128>}, {pipeline_mode = #tpu.pipeline_mode<synchronous>, transform_indices = @transform_4, window_bounds = array<i64: 1, 32>}, {pipeline_mode = #tpu.pipeline_mode<synchronous>, transform_indices = @transform_5, window_bounds = array<i64: 1, 1>}, {pipeline_mode = #tpu.pipeline_mode<synchronous>, transform_indices = @transform_6, window_bounds = array<i64: 8, 1>}]} {
    %c0 = arith.constant 0 : index
    %c0_0 = arith.constant 0 : index
    %0 = vector.load %arg1[%c0, %c0_0] : memref<64x16xf32, #tpu.memory_space<vmem>>, vector<64x16xf32>
    %c0_1 = arith.constant 0 : index
    %c0_2 = arith.constant 0 : index
    %1 = vector.load %arg2[%c0_1, %c0_2] : memref<16x128xf32, #tpu.memory_space<vmem>>, vector<16x128xf32>
    %cst = arith.constant dense<0.000000e+00> : vector<64x128xf32>
    %2 = tpu.matmul %0, %1, %cst {dimension_numbers = #tpu.dot_dimension_numbers<[1], [0], [0], [1], [0, 0, 1, 1], [], []>} : vector<64x16xf32>, vector<16x128xf32>, vector<64x128xf32> -> vector<64x128xf32>
    %c0_3 = arith.constant 0 : index
    %c0_4 = arith.constant 0 : index
    %3 = vector.load %arg4[%c0_3, %c0_4] : memref<1x128xf32, #tpu.memory_space<vmem>>, vector<1x128xf32>
    %4 = vector.broadcast %3 : vector<1x128xf32> to vector<64x128xf32>
    %5 = arith.addf %2, %4 : vector<64x128xf32>
    %c0_5 = arith.constant 0 : index
    %c0_6 = arith.constant 0 : index
    %6 = vector.load %arg8[%c0_5, %c0_6] : memref<64x128xf32, #tpu.memory_space<vmem>>, vector<64x128xf32>
    tpu.vector_store %arg8[%c0_5, %c0_6], %5 {strides = array<i32>} : memref<64x128xf32, #tpu.memory_space<vmem>>, vector<64x128xf32>,
    %cst_7 = arith.constant 0.000000e+00 : f32
    %7 = vector.broadcast %cst_7 : f32 to vector<8x32xf32>
    %cst_8 = arith.constant 0.000000e+00 : f32
    %8 = vector.broadcast %cst_8 : f32 to vector<8x32xf32>
    %c0_i32 = arith.constant 0 : i32
    %c0_9 = arith.constant 0 : index
    %c0_10 = arith.constant 0 : index
    %9 = vector.load %arg3[%c0_9, %c0_10] : memref<32x128xf32, #tpu.memory_space<vmem>>, vector<32x128xf32>
    %cst_11 = arith.constant dense<0.000000e+00> : vector<8x128xf32>
    %10 = tpu.matmul %7, %9, %cst_11 {dimension_numbers = #tpu.dot_dimension_numbers<[1], [0], [0], [1], [0, 0, 1, 1], [], []>} : vector<8x32xf32>, vector<32x128xf32>, vector<8x128xf32> -> vector<8x128xf32>
    %c8_i32 = arith.constant 8 : i32
    %11 = arith.muli %c0_i32, %c8_i32 : i32
    %12 = arith.index_cast %11 : i32 to index
    %c0_12 = arith.constant 0 : index
    %13 = vector.load %arg8[%12, %c0_12] : memref<64x128xf32, #tpu.memory_space<vmem>>, vector<8x128xf32>
    %14 = arith.addf %10, %13 : vector<8x128xf32>
    %15 = vector.extract_strided_slice %14 {offsets = [0, 0], sizes = [8, 96], strides = [1, 1]} : vector<8x128xf32> to vector<8x96xf32>
    %16 = arith.negf %15 : vector<8x96xf32>
    %17 = math.exp %16 : vector<8x96xf32>
    %cst_13 = arith.constant 1.000000e+00 : f32
    %18 = vector.broadcast %cst_13 : f32 to vector<8x96xf32>
    %19 = arith.addf %18, %17 : vector<8x96xf32>
    %20 = arith.divf %18, %19 : vector<8x96xf32>
    %21 = vector.extract_strided_slice %14 {offsets = [0, 96], sizes = [8, 32], strides = [1, 1]} : vector<8x128xf32> to vector<8x32xf32>
    %22 = math.tanh %21 : vector<8x32xf32>
    %23 = vector.extract_strided_slice %20 {offsets = [0, 0], sizes = [8, 32], strides = [1, 1]} : vector<8x96xf32> to vector<8x32xf32>
    %24 = vector.extract_strided_slice %20 {offsets = [0, 32], sizes = [8, 32], strides = [1, 1]} : vector<8x96xf32> to vector<8x32xf32>
    %25 = vector.extract_strided_slice %20 {offsets = [0, 64], sizes = [8, 32], strides = [1, 1]} : vector<8x96xf32> to vector<8x32xf32>
    %26 = arith.mulf %24, %8 : vector<8x32xf32>
    %27 = arith.mulf %23, %22 : vector<8x32xf32>
    %28 = arith.addf %26, %27 : vector<8x32xf32>
    %29 = math.tanh %28 : vector<8x32xf32>
    %30 = arith.mulf %25, %29 : vector<8x32xf32>
    %c1_i32 = arith.constant 1 : i32
    %c0_14 = arith.constant 0 : index
    %c0_15 = arith.constant 0 : index
    %31 = vector.load %arg3[%c0_14, %c0_15] : memref<32x128xf32, #tpu.memory_space<vmem>>, vector<32x128xf32>
    %cst_16 = arith.constant dense<0.000000e+00> : vector<8x128xf32>
    %32 = tpu.matmul %30, %31, %cst_16 {dimension_numbers = #tpu.dot_dimension_numbers<[1], [0], [0], [1], [0, 0, 1, 1], [], []>} : vector<8x32xf32>, vector<32x128xf32>, vector<8x128xf32> -> vector<8x128xf32>
    %c8_i32_17 = arith.constant 8 : i32
    %33 = arith.muli %c1_i32, %c8_i32_17 : i32
    %34 = arith.index_cast %33 : i32 to index
    %c0_18 = arith.constant 0 : index
    %35 = vector.load %arg8[%34, %c0_18] : memref<64x128xf32, #tpu.memory_space<vmem>>, vector<8x128xf32>
    %36 = arith.addf %32, %35 : vector<8x128xf32>
    %37 = vector.extract_strided_slice %36 {offsets = [0, 0], sizes = [8, 96], strides = [1, 1]} : vector<8x128xf32> to vector<8x96xf32>
    %38 = arith.negf %37 : vector<8x96xf32>
    %39 = math.exp %38 : vector<8x96xf32>
    %cst_19 = arith.constant 1.000000e+00 : f32
    %40 = vector.broadcast %cst_19 : f32 to vector<8x96xf32>
    %41 = arith.addf %40, %39 : vector<8x96xf32>
    %42 = arith.divf %40, %41 : vector<8x96xf32>
    %43 = vector.extract_strided_slice %36 {offsets = [0, 96], sizes = [8, 32], strides = [1, 1]} : vector<8x128xf32> to vector<8x32xf32>
    %44 = math.tanh %43 : vector<8x32xf32>
    %45 = vector.extract_strided_slice %42 {offsets = [0, 0], sizes = [8, 32], strides = [1, 1]} : vector<8x96xf32> to vector<8x32xf32>
    %46 = vector.extract_strided_slice %42 {offsets = [0, 32], sizes = [8, 32], strides = [1, 1]} : vector<8x96xf32> to vector<8x32xf32>
    %47 = vector.extract_strided_slice %42 {offsets = [0, 64], sizes = [8, 32], strides = [1, 1]} : vector<8x96xf32> to vector<8x32xf32>
    %48 = arith.mulf %46, %28 : vector<8x32xf32>
    %49 = arith.mulf %45, %44 : vector<8x32xf32>
    %50 = arith.addf %48, %49 : vector<8x32xf32>
    %51 = math.tanh %50 : vector<8x32xf32>
    %52 = arith.mulf %47, %51 : vector<8x32xf32>
    %c2_i32 = arith.constant 2 : i32
    %c0_20 = arith.constant 0 : index
    %c0_21 = arith.constant 0 : index
    %53 = vector.load %arg3[%c0_20, %c0_21] : memref<32x128xf32, #tpu.memory_space<vmem>>, vector<32x128xf32>
    %cst_22 = arith.constant dense<0.000000e+00> : vector<8x128xf32>
    %54 = tpu.matmul %52, %53, %cst_22 {dimension_numbers = #tpu.dot_dimension_numbers<[1], [0], [0], [1], [0, 0, 1, 1], [], []>} : vector<8x32xf32>, vector<32x128xf32>, vector<8x128xf32> -> vector<8x128xf32>
    %c8_i32_23 = arith.constant 8 : i32
    %55 = arith.muli %c2_i32, %c8_i32_23 : i32
    %56 = arith.index_cast %55 : i32 to index
    %c0_24 = arith.constant 0 : index
    %57 = vector.load %arg8[%56, %c0_24] : memref<64x128xf32, #tpu.memory_space<vmem>>, vector<8x128xf32>
    %58 = arith.addf %54, %57 : vector<8x128xf32>
    %59 = vector.extract_strided_slice %58 {offsets = [0, 0], sizes = [8, 96], strides = [1, 1]} : vector<8x128xf32> to vector<8x96xf32>
    %60 = arith.negf %59 : vector<8x96xf32>
    %61 = math.exp %60 : vector<8x96xf32>
    %cst_25 = arith.constant 1.000000e+00 : f32
    %62 = vector.broadcast %cst_25 : f32 to vector<8x96xf32>
    %63 = arith.addf %62, %61 : vector<8x96xf32>
    %64 = arith.divf %62, %63 : vector<8x96xf32>
    %65 = vector.extract_strided_slice %58 {offsets = [0, 96], sizes = [8, 32], strides = [1, 1]} : vector<8x128xf32> to vector<8x32xf32>
    %66 = math.tanh %65 : vector<8x32xf32>
    %67 = vector.extract_strided_slice %64 {offsets = [0, 0], sizes = [8, 32], strides = [1, 1]} : vector<8x96xf32> to vector<8x32xf32>
    %68 = vector.extract_strided_slice %64 {offsets = [0, 32], sizes = [8, 32], strides = [1, 1]} : vector<8x96xf32> to vector<8x32xf32>
    %69 = vector.extract_strided_slice %64 {offsets = [0, 64], sizes = [8, 32], strides = [1, 1]} : vector<8x96xf32> to vector<8x32xf32>
    %70 = arith.mulf %68, %50 : vector<8x32xf32>
    %71 = arith.mulf %67, %66 : vector<8x32xf32>
    %72 = arith.addf %70, %71 : vector<8x32xf32>
    %73 = math.tanh %72 : vector<8x32xf32>
    %74 = arith.mulf %69, %73 : vector<8x32xf32>
    %c3_i32 = arith.constant 3 : i32
    %c0_26 = arith.constant 0 : index
    %c0_27 = arith.constant 0 : index
    %75 = vector.load %arg3[%c0_26, %c0_27] : memref<32x128xf32, #tpu.memory_space<vmem>>, vector<32x128xf32>
    %cst_28 = arith.constant dense<0.000000e+00> : vector<8x128xf32>
    %76 = tpu.matmul %74, %75, %cst_28 {dimension_numbers = #tpu.dot_dimension_numbers<[1], [0], [0], [1], [0, 0, 1, 1], [], []>} : vector<8x32xf32>, vector<32x128xf32>, vector<8x128xf32> -> vector<8x128xf32>
    %c8_i32_29 = arith.constant 8 : i32
    %77 = arith.muli %c3_i32, %c8_i32_29 : i32
    %78 = arith.index_cast %77 : i32 to index
    %c0_30 = arith.constant 0 : index
    %79 = vector.load %arg8[%78, %c0_30] : memref<64x128xf32, #tpu.memory_space<vmem>>, vector<8x128xf32>
    %80 = arith.addf %76, %79 : vector<8x128xf32>
    %81 = vector.extract_strided_slice %80 {offsets = [0, 0], sizes = [8, 96], strides = [1, 1]} : vector<8x128xf32> to vector<8x96xf32>
    %82 = arith.negf %81 : vector<8x96xf32>
    %83 = math.exp %82 : vector<8x96xf32>
    %cst_31 = arith.constant 1.000000e+00 : f32
    %84 = vector.broadcast %cst_31 : f32 to vector<8x96xf32>
    %85 = arith.addf %84, %83 : vector<8x96xf32>
    %86 = arith.divf %84, %85 : vector<8x96xf32>
    %87 = vector.extract_strided_slice %80 {offsets = [0, 96], sizes = [8, 32], strides = [1, 1]} : vector<8x128xf32> to vector<8x32xf32>
    %88 = math.tanh %87 : vector<8x32xf32>
    %89 = vector.extract_strided_slice %86 {offsets = [0, 0], sizes = [8, 32], strides = [1, 1]} : vector<8x96xf32> to vector<8x32xf32>
    %90 = vector.extract_strided_slice %86 {offsets = [0, 32], sizes = [8, 32], strides = [1, 1]} : vector<8x96xf32> to vector<8x32xf32>
    %91 = vector.extract_strided_slice %86 {offsets = [0, 64], sizes = [8, 32], strides = [1, 1]} : vector<8x96xf32> to vector<8x32xf32>
    %92 = arith.mulf %90, %72 : vector<8x32xf32>
    %93 = arith.mulf %89, %88 : vector<8x32xf32>
    %94 = arith.addf %92, %93 : vector<8x32xf32>
    %95 = math.tanh %94 : vector<8x32xf32>
    %96 = arith.mulf %91, %95 : vector<8x32xf32>
    %c4_i32 = arith.constant 4 : i32
    %c0_32 = arith.constant 0 : index
    %c0_33 = arith.constant 0 : index
    %97 = vector.load %arg3[%c0_32, %c0_33] : memref<32x128xf32, #tpu.memory_space<vmem>>, vector<32x128xf32>
    %cst_34 = arith.constant dense<0.000000e+00> : vector<8x128xf32>
    %98 = tpu.matmul %96, %97, %cst_34 {dimension_numbers = #tpu.dot_dimension_numbers<[1], [0], [0], [1], [0, 0, 1, 1], [], []>} : vector<8x32xf32>, vector<32x128xf32>, vector<8x128xf32> -> vector<8x128xf32>
    %c8_i32_35 = arith.constant 8 : i32
    %99 = arith.muli %c4_i32, %c8_i32_35 : i32
    %100 = arith.index_cast %99 : i32 to index
    %c0_36 = arith.constant 0 : index
    %101 = vector.load %arg8[%100, %c0_36] : memref<64x128xf32, #tpu.memory_space<vmem>>, vector<8x128xf32>
    %102 = arith.addf %98, %101 : vector<8x128xf32>
    %103 = vector.extract_strided_slice %102 {offsets = [0, 0], sizes = [8, 96], strides = [1, 1]} : vector<8x128xf32> to vector<8x96xf32>
    %104 = arith.negf %103 : vector<8x96xf32>
    %105 = math.exp %104 : vector<8x96xf32>
    %cst_37 = arith.constant 1.000000e+00 : f32
    %106 = vector.broadcast %cst_37 : f32 to vector<8x96xf32>
    %107 = arith.addf %106, %105 : vector<8x96xf32>
    %108 = arith.divf %106, %107 : vector<8x96xf32>
    %109 = vector.extract_strided_slice %102 {offsets = [0, 96], sizes = [8, 32], strides = [1, 1]} : vector<8x128xf32> to vector<8x32xf32>
    %110 = math.tanh %109 : vector<8x32xf32>
    %111 = vector.extract_strided_slice %108 {offsets = [0, 0], sizes = [8, 32], strides = [1, 1]} : vector<8x96xf32> to vector<8x32xf32>
    %112 = vector.extract_strided_slice %108 {offsets = [0, 32], sizes = [8, 32], strides = [1, 1]} : vector<8x96xf32> to vector<8x32xf32>
    %113 = vector.extract_strided_slice %108 {offsets = [0, 64], sizes = [8, 32], strides = [1, 1]} : vector<8x96xf32> to vector<8x32xf32>
    %114 = arith.mulf %112, %94 : vector<8x32xf32>
    %115 = arith.mulf %111, %110 : vector<8x32xf32>
    %116 = arith.addf %114, %115 : vector<8x32xf32>
    %117 = math.tanh %116 : vector<8x32xf32>
    %118 = arith.mulf %113, %117 : vector<8x32xf32>
    %c5_i32 = arith.constant 5 : i32
    %c0_38 = arith.constant 0 : index
    %c0_39 = arith.constant 0 : index
    %119 = vector.load %arg3[%c0_38, %c0_39] : memref<32x128xf32, #tpu.memory_space<vmem>>, vector<32x128xf32>
    %cst_40 = arith.constant dense<0.000000e+00> : vector<8x128xf32>
    %120 = tpu.matmul %118, %119, %cst_40 {dimension_numbers = #tpu.dot_dimension_numbers<[1], [0], [0], [1], [0, 0, 1, 1], [], []>} : vector<8x32xf32>, vector<32x128xf32>, vector<8x128xf32> -> vector<8x128xf32>
    %c8_i32_41 = arith.constant 8 : i32
    %121 = arith.muli %c5_i32, %c8_i32_41 : i32
    %122 = arith.index_cast %121 : i32 to index
    %c0_42 = arith.constant 0 : index
    %123 = vector.load %arg8[%122, %c0_42] : memref<64x128xf32, #tpu.memory_space<vmem>>, vector<8x128xf32>
    %124 = arith.addf %120, %123 : vector<8x128xf32>
    %125 = vector.extract_strided_slice %124 {offsets = [0, 0], sizes = [8, 96], strides = [1, 1]} : vector<8x128xf32> to vector<8x96xf32>
    %126 = arith.negf %125 : vector<8x96xf32>
    %127 = math.exp %126 : vector<8x96xf32>
    %cst_43 = arith.constant 1.000000e+00 : f32
    %128 = vector.broadcast %cst_43 : f32 to vector<8x96xf32>
    %129 = arith.addf %128, %127 : vector<8x96xf32>
    %130 = arith.divf %128, %129 : vector<8x96xf32>
    %131 = vector.extract_strided_slice %124 {offsets = [0, 96], sizes = [8, 32], strides = [1, 1]} : vector<8x128xf32> to vector<8x32xf32>
    %132 = math.tanh %131 : vector<8x32xf32>
    %133 = vector.extract_strided_slice %130 {offsets = [0, 0], sizes = [8, 32], strides = [1, 1]} : vector<8x96xf32> to vector<8x32xf32>
    %134 = vector.extract_strided_slice %130 {offsets = [0, 32], sizes = [8, 32], strides = [1, 1]} : vector<8x96xf32> to vector<8x32xf32>
    %135 = vector.extract_strided_slice %130 {offsets = [0, 64], sizes = [8, 32], strides = [1, 1]} : vector<8x96xf32> to vector<8x32xf32>
    %136 = arith.mulf %134, %116 : vector<8x32xf32>
    %137 = arith.mulf %133, %132 : vector<8x32xf32>
    %138 = arith.addf %136, %137 : vector<8x32xf32>
    %139 = math.tanh %138 : vector<8x32xf32>
    %140 = arith.mulf %135, %139 : vector<8x32xf32>
    %c6_i32 = arith.constant 6 : i32
    %c0_44 = arith.constant 0 : index
    %c0_45 = arith.constant 0 : index
    %141 = vector.load %arg3[%c0_44, %c0_45] : memref<32x128xf32, #tpu.memory_space<vmem>>, vector<32x128xf32>
    %cst_46 = arith.constant dense<0.000000e+00> : vector<8x128xf32>
    %142 = tpu.matmul %140, %141, %cst_46 {dimension_numbers = #tpu.dot_dimension_numbers<[1], [0], [0], [1], [0, 0, 1, 1], [], []>} : vector<8x32xf32>, vector<32x128xf32>, vector<8x128xf32> -> vector<8x128xf32>
    %c8_i32_47 = arith.constant 8 : i32
    %143 = arith.muli %c6_i32, %c8_i32_47 : i32
    %144 = arith.index_cast %143 : i32 to index
    %c0_48 = arith.constant 0 : index
    %145 = vector.load %arg8[%144, %c0_48] : memref<64x128xf32, #tpu.memory_space<vmem>>, vector<8x128xf32>
    %146 = arith.addf %142, %145 : vector<8x128xf32>
    %147 = vector.extract_strided_slice %146 {offsets = [0, 0], sizes = [8, 96], strides = [1, 1]} : vector<8x128xf32> to vector<8x96xf32>
    %148 = arith.negf %147 : vector<8x96xf32>
    %149 = math.exp %148 : vector<8x96xf32>
    %cst_49 = arith.constant 1.000000e+00 : f32
    %150 = vector.broadcast %cst_49 : f32 to vector<8x96xf32>
    %151 = arith.addf %150, %149 : vector<8x96xf32>
    %152 = arith.divf %150, %151 : vector<8x96xf32>
    %153 = vector.extract_strided_slice %146 {offsets = [0, 96], sizes = [8, 32], strides = [1, 1]} : vector<8x128xf32> to vector<8x32xf32>
    %154 = math.tanh %153 : vector<8x32xf32>
    %155 = vector.extract_strided_slice %152 {offsets = [0, 0], sizes = [8, 32], strides = [1, 1]} : vector<8x96xf32> to vector<8x32xf32>
    %156 = vector.extract_strided_slice %152 {offsets = [0, 32], sizes = [8, 32], strides = [1, 1]} : vector<8x96xf32> to vector<8x32xf32>
    %157 = vector.extract_strided_slice %152 {offsets = [0, 64], sizes = [8, 32], strides = [1, 1]} : vector<8x96xf32> to vector<8x32xf32>
    %158 = arith.mulf %156, %138 : vector<8x32xf32>
    %159 = arith.mulf %155, %154 : vector<8x32xf32>
    %160 = arith.addf %158, %159 : vector<8x32xf32>
    %161 = math.tanh %160 : vector<8x32xf32>
    %162 = arith.mulf %157, %161 : vector<8x32xf32>
    %c7_i32 = arith.constant 7 : i32
    %c0_50 = arith.constant 0 : index
    %c0_51 = arith.constant 0 : index
    %163 = vector.load %arg3[%c0_50, %c0_51] : memref<32x128xf32, #tpu.memory_space<vmem>>, vector<32x128xf32>
    %cst_52 = arith.constant dense<0.000000e+00> : vector<8x128xf32>
    %164 = tpu.matmul %162, %163, %cst_52 {dimension_numbers = #tpu.dot_dimension_numbers<[1], [0], [0], [1], [0, 0, 1, 1], [], []>} : vector<8x32xf32>, vector<32x128xf32>, vector<8x128xf32> -> vector<8x128xf32>
    %c8_i32_53 = arith.constant 8 : i32
    %165 = arith.muli %c7_i32, %c8_i32_53 : i32
    %166 = arith.index_cast %165 : i32 to index
    %c0_54 = arith.constant 0 : index
    %167 = vector.load %arg8[%166, %c0_54] : memref<64x128xf32, #tpu.memory_space<vmem>>, vector<8x128xf32>
    %168 = arith.addf %164, %167 : vector<8x128xf32>
    %169 = vector.extract_strided_slice %168 {offsets = [0, 0], sizes = [8, 96], strides = [1, 1]} : vector<8x128xf32> to vector<8x96xf32>
    %170 = arith.negf %169 : vector<8x96xf32>
    %171 = math.exp %170 : vector<8x96xf32>
    %cst_55 = arith.constant 1.000000e+00 : f32
    %172 = vector.broadcast %cst_55 : f32 to vector<8x96xf32>
    %173 = arith.addf %172, %171 : vector<8x96xf32>
    %174 = arith.divf %172, %173 : vector<8x96xf32>
    %175 = vector.extract_strided_slice %168 {offsets = [0, 96], sizes = [8, 32], strides = [1, 1]} : vector<8x128xf32> to vector<8x32xf32>
    %176 = math.tanh %175 : vector<8x32xf32>
    %177 = vector.extract_strided_slice %174 {offsets = [0, 0], sizes = [8, 32], strides = [1, 1]} : vector<8x96xf32> to vector<8x32xf32>
    %178 = vector.extract_strided_slice %174 {offsets = [0, 32], sizes = [8, 32], strides = [1, 1]} : vector<8x96xf32> to vector<8x32xf32>
    %179 = vector.extract_strided_slice %174 {offsets = [0, 64], sizes = [8, 32], strides = [1, 1]} : vector<8x96xf32> to vector<8x32xf32>
    %180 = arith.mulf %178, %160 : vector<8x32xf32>
    %181 = arith.mulf %177, %176 : vector<8x32xf32>
    %182 = arith.addf %180, %181 : vector<8x32xf32>
    %183 = math.tanh %182 : vector<8x32xf32>
    %184 = arith.mulf %179, %183 : vector<8x32xf32>
    %c8_i32_56 = arith.constant 8 : i32
    %c0_57 = arith.constant 0 : index
    %c0_58 = arith.constant 0 : index
    %185 = vector.load %arg5[%c0_57, %c0_58] : memref<1x32xf32, #tpu.memory_space<vmem>>, vector<1x32xf32>
    %186 = vector.broadcast %185 : vector<1x32xf32> to vector<8x32xf32>
    %187 = arith.mulf %184, %186 : vector<8x32xf32>
    %cst_59 = arith.constant dense<0.000000e+00> : vector<8xf32>
    %188 = vector.multi_reduction <add>, %187, %cst_59 [1] : vector<8x32xf32> to vector<8xf32>
    %189 = vector.shape_cast %188 : vector<8xf32> to vector<8x1xf32>
    %c0_60 = arith.constant 0 : index
    %c0_61 = arith.constant 0 : index
    %190 = vector.load %arg6[%c0_60, %c0_61] : memref<1x1xf32, #tpu.memory_space<vmem>>, vector<1x1xf32>
    %191 = vector.broadcast %190 : vector<1x1xf32> to vector<8x1xf32>
    %192 = arith.addf %189, %191 : vector<8x1xf32>
    %c0_62 = arith.constant 0 : index
    %c0_63 = arith.constant 0 : index
    %193 = vector.load %arg7[%c0_62, %c0_63] : memref<8x1xf32, #tpu.memory_space<vmem>>, vector<8x1xf32>
    tpu.vector_store %arg7[%c0_62, %c0_63], %192 {strides = array<i32>} : memref<8x1xf32, #tpu.memory_space<vmem>>, vector<8x1xf32>,
    return
  }
  func.func @transform_0(%arg0: i32) -> (i32, i32) {
    %c0_i32 = arith.constant 0 : i32
    %c0_i32_0 = arith.constant 0 : i32
    %c0_i32_1 = arith.constant 0 : i32
    return %c0_i32, %c0_i32_0 : i32, i32
  }
  func.func @transform_1(%arg0: i32) -> (i32, i32) {
    %c0_i32 = arith.constant 0 : i32
    %c0_i32_0 = arith.constant 0 : i32
    %c0_i32_1 = arith.constant 0 : i32
    return %c0_i32, %c0_i32_0 : i32, i32
  }
  func.func @transform_2(%arg0: i32) -> (i32, i32) {
    %c0_i32 = arith.constant 0 : i32
    %c0_i32_0 = arith.constant 0 : i32
    %c0_i32_1 = arith.constant 0 : i32
    return %c0_i32, %c0_i32_0 : i32, i32
  }
  func.func @transform_3(%arg0: i32) -> (i32, i32) {
    %c0_i32 = arith.constant 0 : i32
    %c0_i32_0 = arith.constant 0 : i32
    %c0_i32_1 = arith.constant 0 : i32
    return %c0_i32, %c0_i32_0 : i32, i32
  }
  func.func @transform_4(%arg0: i32) -> (i32, i32) {
    %c0_i32 = arith.constant 0 : i32
    %c0_i32_0 = arith.constant 0 : i32
    %c0_i32_1 = arith.constant 0 : i32
    return %c0_i32, %c0_i32_0 : i32, i32
  }
  func.func @transform_5(%arg0: i32) -> (i32, i32) {
    %c0_i32 = arith.constant 0 : i32
    %c0_i32_0 = arith.constant 0 : i32
    %c0_i32_1 = arith.constant 0 : i32
    return %c0_i32, %c0_i32_0 : i32, i32
  }
  func.func @transform_6(%arg0: i32) -> (i32, i32) {
    %c0_i32 = arith.constant 0 : i32
    %c0_i32_0 = arith.constant 0 : i32
    %c0_i32_1 = arith.constant 0 : i32
    return %c0_i32, %c0_i32_0 : i32, i32
  }
}

</mosaic_0001>

<bundles_post_ra>
// kernel: tpu_custom_call.1
= control target key start
LH: loop header
LB: loop body
LE: loop exit
PB: predicated region body
PF: predicated region fallthrough
CT: control target
= control target key end

     0   :  { %vm42_vm0 = vcmask 130048   ;;  %v1315_v0 = vmov 0.0|0.0   ;;  %vm1316_vm1 = vmmov 0   ;;  %v1317_v4 = vmov 0.0   ;;  %s1318_s13 = smov 32   ;;  %s1533_s1 = inlined_call_operand.vmem [shape: f32[16,128], index: 1, kind: input, shape index: {}]   ;;  %s1534_s2 = inlined_call_operand.vmem [shape: f32[32,128], index: 2, kind: input, shape index: {}]   ;;  %s1535_s0 = inlined_call_operand.vmem [shape: f32[64,16], index: 0, kind: input, shape index: {}]   ;;  %s1536_s3 = inlined_call_operand.vmem [shape: f32[1,128], index: 3, kind: input, shape index: {}]   ;;  %s1537_s4 = inlined_call_operand.vmem [shape: f32[1,32], index: 4, kind: input, shape index: {}]   ;;  %s1538_s5 = inlined_call_operand.<no memory space> [shape: f32[1,1], index: 5, kind: input, shape index: {}]   ;;  %s1539_s6 = inlined_call_operand.vmem [shape: f32[8,1], index: 6, kind: output, shape index: {}]  }
   0x1   :  { %1198 = vmatprep.subr.bf16.mxu1 %v1315_v0  ;;  %v33_v1 = vld [vmem:[%s1533_s1] sm:$0xff]  ;;  %v34_v2 = vld [vmem:[%s1533_s1 + $0x8] sm:$0xff]  ;;  %1114 = vmatprep.mubr.msk.f32.mxu1 %vm1316_vm1, %v1317_v4  ;;  %v182_v9 = vld [vmem:[%s1534_s2 + $0x10] sm:$0xff]  ;;  %vm185_vm2 = vcmask 261120   ;;  %vm1008_vm3 = vcmask 7168  }
   0x2   :  { %v180_v3 = vld [vmem:[%s1534_s2] sm:$0xff]  ;;  %v1194_v5 = vpack.c.bf16 %v34_v2, %v33_v1  ;;  %v181_v6 = vld [vmem:[%s1534_s2 + $0x8] sm:$0xff]  ;;  %v183_v10 = vld [vmem:[%s1534_s2 + $0x18] sm:$0xff] }
   0x3   :  { %v25_v7 = vld [vmem:[%s1535_s0] sm:$0xff]  ;;  %v1373_v8 = vpack.c.bf16 %v181_v6, %v180_v3  ;;  %v26_v11 = vld [vmem:[%s1535_s0 + $0x8] sm:$0xff]  ;;  %v1386_v12 = vpack.c.bf16 %v183_v10, %v182_v9  ;;  %v27_v48 = vld [vmem:[%s1535_s0 + $0x10] sm:$0xff] }
   0x4   :  { %1094 = vmatprep.mubr.msk.f32.mxu0 %vm42_vm0, %v25_v7  ;;  %1195 = vmatprep.subr.bf16.mxu0 %v1194_v5  ;;  %v1407_v13 = vld [vmem:[%s1536_s3] ss:$0 sm:$0xff]  ;;  %s1319_s3 = smov 64   ;;  %v28_v49 = vld [vmem:[%s1535_s0 + $0x18] sm:$0xff]  ;;  %v30_v51 = vld [vmem:[%s1535_s0 + $0x28] sm:$0xff] }
   0x5   :  { %1200 = vmatpush3.bf16.msra.mxu1 %v1373_v8  ;;  %1197 = vmatpush3.bf16.msra.mxu0 %v1194_v5  ;;  %v29_v50 = vld [vmem:[%s1535_s0 + $0x20] sm:$0xff]  ;;  %v31_v52 = vld [vmem:[%s1535_s0 + $0x30] sm:$0xff]  ;;  %v32_v53 = vld [vmem:[%s1535_s0 + $0x38] sm:$0xff] }
   0x6   :  { %1201 = vmatprep.subr.bf16.mxu1 %v1315_v0  ;;  %1210 = vmatprep.subr.bf16.mxu0 %v1315_v0 }
   0x8   :  { %1095 = vmatmul.mubr.msk.f32.vlgmr.msra.gmra.mrb[0].mxu0 %vm42_vm0, %v26_v11 }
   0x9   :  { %1203 = vmatpush3.bf16.msra.mxu1 %v1386_v12  ;;  %1212 = vmatpush3.bf16.msra.mxu0 %v1373_v8 }
   0xa   :  { %1204 = vmatprep.subr.bf16.mxu1 %v1315_v0  ;;  %1213 = vmatprep.subr.bf16.mxu0 %v1315_v0 }
   0xb   :  { %1097 = vmatprep.mubr.msk.f32.mxu0 %vm42_vm0, %v27_v48 }
   0xc   :  { %1115 = vmatmul.mubr.f32.vlgmr.msra.gmra.mrb[0].mxu1 %v1317_v4  ;;  %1098 = vmatmul.mubr.msk.f32.gmra.mrb[2].mxu0 %vm42_vm0, %v28_v49 }
   0xd   :  { %1206 = vmatpush3.bf16.msra.mxu1 %v1373_v8  ;;  %1125 = vmatprep.mubr.msk.f32.mxu1 %vm1316_vm1, %v1317_v4 }
   0xe   :  { %1207 = vmatprep.subr.bf16.mxu1 %v1315_v0  ;;  %1215 = vmatpush3.bf16.msra.mxu0 %v1386_v12 }
   0xf   :  { %1222 = vmatprep.subr.bf16.mxu0 %v1315_v0  ;;  %1100 = vmatprep.mubr.msk.f32.mxu0 %vm42_vm0, %v29_v50 }
  0x10   :  { %1101 = vmatmul.mubr.msk.f32.gmra.mrb[4].mxu0 %vm42_vm0, %v30_v51 }
  0x11   :  { %1209 = vmatpush3.bf16.msra.mxu1 %v1386_v12  ;;  %1103 = vmatprep.mubr.msk.f32.mxu0 %vm42_vm0, %v31_v52 }
  0x12   :  { %1216 = vmatprep.subr.bf16.mxu1 %v1315_v0 }
  0x14   :  { %1104 = vmatmul.mubr.msk.f32.gmra.mrb[6].mxu0 %vm42_vm0, %v32_v53 }
  0x15   :  { %1136 = vmatprep.mubr.msk.f32.mxu0 %vm1316_vm1, %v1317_v4 }
  0xdb   :  { %v1096_v14 = vpop.f32.mrb[0].mxu0 }
  0xdc   :  { %v133_v15 = vpop.f32.mrb[1].mxu0  ;;  %v139_v34 = vadd.f32 %v1096_v14, %v1407_v13 }
  0xdd   :  { %v134_v16 = vadd.f32 %v1407_v13, %v133_v15 }
  0xdf   :  { %v255_v17 = vpop.f32.mrb[0].mxu1  ;;  %v1099_v57 = vpop.f32.mrb[2].mxu0 }
  0xe0   :  { %v256_v18 = vadd.f32 %v255_v17, %v134_v16  ;;  %v1116_v19 = vpop.f32.mrb[1].mxu1  ;;  %v143_v58 = vpop.f32.mrb[3].mxu0 }
  0xe1   :  { %v144_v1 = vadd.f32 %v1407_v13, %v143_v58 }
  0xe2   :  { %1251 = vtanh.f32 %v256_v18  ;;  %v1023_v21 = vmul.f32 -1.442695, %v256_v18 }
  0xe3   :  { %v1452_v59 = vpop.f32.mrb[4].mxu0 }
  0xe4   :  { %1253 = vpow2.f32 %v1023_v21  ;;  %v1454_v60 = vpop.f32.mrb[5].mxu0 }
  0xe7   :  { %v1456_v61 = vpop.f32.mrb[6].mxu0 }
  0xe8   :  { %v1458_v62 = vpop.f32.mrb[7].mxu0 }
  0xec   :  { %v1252_v20 = vpop.eup %1251 }
  0xed   :  { %268 = vrot.lane.b32.xlu0 %v1252_v20, %s1318_s13 }
  0xee   :  { %v1254_v22 = vpop.eup %1253 }
  0xef   :  { %v262_v23 = vadd.f32 1.0, %v1254_v22 }
  0xf1   :  { %1255 = vrcp.f32 %v262_v23  ;;  %v149_v23 = vadd.f32 %v1099_v57, %v1407_v13 }
  0xfb   :  { %v1256_v24 = vpop.eup %1255 }
  0xfc   :  { %v266_v27 = vmul.f32 0.0, %v1256_v24 }
 0x15f   :  { %v269_v25 = vpop.permute.xlu0 %268 }
 0x160   :  { %v271_v26 = vmul.f32 %v1256_v24, %v269_v25 }
 0x162   :  { %273 = vrot.lane.b32.xlu0 %v271_v26, %s1318_s13 }
 0x1d4   :  { %v274_v28 = vpop.permute.xlu0 %273 }
 0x1d5   :  { %v276_v29 = vadd.f32 %v274_v28, %v266_v27 }
 0x1d7   :  { %1257 = vtanh.f32 %v276_v29 }
 0x1e1   :  { %v1258_v30 = vpop.eup %1257 }
 0x1e2   :  { %279 = vrot.lane.b32.xlu1 %v1258_v30, %s1318_s13 }
 0x254   :  { %v280_v31 = vpop.permute.xlu1 %279 }
 0x255   :  { %v282_v32 = vmul.f32 %v1256_v24, %v280_v31 }
 0x257   :  { %285 = vrot.lane.b32.xlu1 %v282_v32, %s1319_s3 }
 0x2c9   :  { %v286_v33 = vpop.permute.xlu1 %285 }
 0x2ca   :  { %1126 = vmatmul.mubr.msk.f32.vlgmr.msra.gmra.mrb[2].mxu1 %vm185_vm2, %v286_v33 }
 0x2cb   :  { %1218 = vmatpush3.bf16.msra.mxu1 %v1373_v8  ;;  %1147 = vmatprep.mubr.msk.f32.mxu1 %vm1316_vm1, %v1317_v4 }
 0x2cc   :  { %1219 = vmatprep.subr.bf16.mxu1 %v1315_v0 }
 0x2cf   :  { %1221 = vmatpush3.bf16.msra.mxu1 %v1386_v12 }
 0x2d0   :  { %1228 = vmatprep.subr.bf16.mxu1 %v1315_v0 }
 0x39d   :  { %v355_v35 = vpop.f32.mrb[2].mxu1 }
 0x39e   :  { %v356_v36 = vadd.f32 %v355_v35, %v139_v34  ;;  %v1127_v37 = vpop.f32.mrb[3].mxu1 }
 0x3a0   :  { %1259 = vtanh.f32 %v356_v36  ;;  %v1025_v39 = vmul.f32 -1.442695, %v356_v36 }
 0x3a2   :  { %1261 = vpow2.f32 %v1025_v39 }
 0x3aa   :  { %v1260_v38 = vpop.eup %1259 }
 0x3ab   :  { %368 = vrot.lane.b32.xlu0 %v1260_v38, %s1318_s13 }
 0x3ac   :  { %v1262_v40 = vpop.eup %1261 }
 0x3ad   :  { %v362_v41 = vadd.f32 1.0, %v1262_v40 }
 0x3af   :  { %1263 = vrcp.f32 %v362_v41  ;;  %v154_v41 = vadd.f32 %v1407_v13, %v1454_v60  ;;  %v159_v60 = vadd.f32 %v1452_v59, %v1407_v13 }
 0x3b9   :  { %v1264_v42 = vpop.eup %1263 }
 0x3ba   :  { %v366_v45 = vmul.f32 %v1264_v42, %v276_v29 }
 0x41d   :  { %v369_v43 = vpop.permute.xlu0 %368 }
 0x41e   :  { %v371_v44 = vmul.f32 %v1264_v42, %v369_v43 }
 0x420   :  { %373 = vrot.lane.b32.xlu1 %v371_v44, %s1318_s13 }
 0x492   :  { %v374_v46 = vpop.permute.xlu1 %373 }
 0x493   :  { %v376_v47 = vadd.f32 %v374_v46, %v366_v45 }
 0x495   :  { %1265 = vtanh.f32 %v376_v47 }
 0x49f   :  { %v1266_v54 = vpop.eup %1265 }
 0x4a0   :  { %379 = vrot.lane.b32.xlu0 %v1266_v54, %s1318_s13 }
 0x512   :  { %v380_v55 = vpop.permute.xlu0 %379 }
 0x513   :  { %v382_v56 = vmul.f32 %v1264_v42, %v380_v55 }
 0x515   :  { %385 = vrot.lane.b32.xlu1 %v382_v56, %s1319_s3 }
 0x587   :  { %v386_v63 = vpop.permute.xlu1 %385 }
 0x588   :  { %1137 = vmatmul.mubr.msk.f32.vlgmr.msra.gmra.mrb[8].mxu0 %vm185_vm2, %v386_v63 }
 0x589   :  { %1224 = vmatpush3.bf16.msra.mxu0 %v1373_v8  ;;  %1158 = vmatprep.mubr.msk.f32.mxu0 %vm1316_vm1, %v1317_v4 }
 0x58a   :  { %1225 = vmatprep.subr.bf16.mxu0 %v1315_v0 }
 0x58d   :  { %1227 = vmatpush3.bf16.msra.mxu0 %v1386_v12 }
 0x58e   :  { %1234 = vmatprep.subr.bf16.mxu0 %v1315_v0 }
 0x65b   :  { %v455_v2 = vpop.f32.mrb[8].mxu0 }
 0x65c   :  { %v456_v3 = vadd.f32 %v455_v2, %v144_v1  ;;  %v1138_v5 = vpop.f32.mrb[9].mxu0 }
 0x65e   :  { %1267 = vtanh.f32 %v456_v3  ;;  %v1027_v7 = vmul.f32 -1.442695, %v456_v3 }
 0x660   :  { %1269 = vpow2.f32 %v1027_v7 }
 0x668   :  { %v1268_v6 = vpop.eup %1267 }
 0x669   :  { %468 = vrot.lane.b32.xlu0 %v1268_v6, %s1318_s13 }
 0x66a   :  { %v1270_v9 = vpop.eup %1269 }
 0x66b   :  { %v462_v10 = vadd.f32 1.0, %v1270_v9 }
 0x66d   :  { %1271 = vrcp.f32 %v462_v10 }
 0x677   :  { %v1272_v11 = vpop.eup %1271 }
 0x678   :  { %v466_v16 = vmul.f32 %v1272_v11, %v376_v47 }
 0x6db   :  { %v469_v14 = vpop.permute.xlu0 %468 }
 0x6dc   :  { %v471_v15 = vmul.f32 %v1272_v11, %v469_v14 }
 0x6de   :  { %473 = vrot.lane.b32.xlu1 %v471_v15, %s1318_s13 }
 0x750   :  { %v474_v17 = vpop.permute.xlu1 %473 }
 0x751   :  { %v476_v18 = vadd.f32 %v474_v17, %v466_v16  ;;  %v164_v16 = vadd.f32 %v1407_v13, %v1458_v62 }
 0x753   :  { %1273 = vtanh.f32 %v476_v18 }
 0x75d   :  { %v1274_v19 = vpop.eup %1273 }
 0x75e   :  { %479 = vrot.lane.b32.xlu0 %v1274_v19, %s1318_s13 }
 0x7d0   :  { %v480_v20 = vpop.permute.xlu0 %479 }
 0x7d1   :  { %v482_v21 = vmul.f32 %v1272_v11, %v480_v20 }
 0x7d3   :  { %485 = vrot.lane.b32.xlu1 %v482_v21, %s1319_s3 }
 0x845   :  { %v486_v22 = vpop.permute.xlu1 %485 }
 0x846   :  { %1148 = vmatmul.mubr.msk.f32.vlgmr.msra.gmra.mrb[4].mxu1 %vm185_vm2, %v486_v22 }
 0x847   :  { %1230 = vmatpush3.bf16.msra.mxu1 %v1373_v8  ;;  %1169 = vmatprep.mubr.msk.f32.mxu1 %vm1316_vm1, %v1317_v4 }
 0x848   :  { %1231 = vmatprep.subr.bf16.mxu1 %v1315_v0 }
 0x84b   :  { %1233 = vmatpush3.bf16.msra.mxu1 %v1386_v12 }
 0x84c   :  { %1240 = vmatprep.subr.bf16.mxu1 %v1315_v0 }
 0x919   :  { %v555_v24 = vpop.f32.mrb[4].mxu1 }
 0x91a   :  { %v556_v25 = vadd.f32 %v555_v24, %v149_v23  ;;  %v1149_v26 = vpop.f32.mrb[5].mxu1 }
 0x91c   :  { %1275 = vtanh.f32 %v556_v25  ;;  %v1029_v28 = vmul.f32 -1.442695, %v556_v25 }
 0x91e   :  { %1277 = vpow2.f32 %v1029_v28 }
 0x926   :  { %v1276_v27 = vpop.eup %1275 }
 0x927   :  { %568 = vrot.lane.b32.xlu0 %v1276_v27, %s1318_s13 }
 0x928   :  { %v1278_v29 = vpop.eup %1277 }
 0x929   :  { %v562_v30 = vadd.f32 1.0, %v1278_v29 }
 0x92b   :  { %1279 = vrcp.f32 %v562_v30 }
 0x935   :  { %v1280_v31 = vpop.eup %1279 }
 0x936   :  { %v566_v34 = vmul.f32 %v1280_v31, %v476_v18 }
 0x999   :  { %v569_v32 = vpop.permute.xlu0 %568 }
 0x99a   :  { %v571_v33 = vmul.f32 %v1280_v31, %v569_v32 }
 0x99c   :  { %573 = vrot.lane.b32.xlu1 %v571_v33, %s1318_s13  ;;  %v169_v33 = vadd.f32 %v1456_v61, %v1407_v13  ;;  %v1038_v13 = vld [vmem:[%s1537_s4] ss:$0 sm:$0xff] }
 0xa0e   :  { %v574_v35 = vpop.permute.xlu1 %573 }
 0xa0f   :  { %v576_v36 = vadd.f32 %v574_v35, %v566_v34 }
 0xa11   :  { %1281 = vtanh.f32 %v576_v36 }
 0xa1b   :  { %v1282_v37 = vpop.eup %1281 }
 0xa1c   :  { %579 = vrot.lane.b32.xlu0 %v1282_v37, %s1318_s13 }
 0xa8e   :  { %v580_v38 = vpop.permute.xlu0 %579 }
 0xa8f   :  { %v582_v39 = vmul.f32 %v1280_v31, %v580_v38 }
 0xa91   :  { %585 = vrot.lane.b32.xlu1 %v582_v39, %s1319_s3 }
 0xb03   :  { %v586_v40 = vpop.permute.xlu1 %585 }
 0xb04   :  { %1159 = vmatmul.mubr.msk.f32.vlgmr.msra.gmra.mrb[10].mxu0 %vm185_vm2, %v586_v40 }
 0xb05   :  { %1236 = vmatpush3.bf16.msra.mxu0 %v1373_v8  ;;  %1180 = vmatprep.mubr.msk.f32.mxu0 %vm1316_vm1, %v1317_v4 }
 0xb06   :  { %1237 = vmatprep.subr.bf16.mxu0 %v1315_v0 }
 0xb09   :  { %1239 = vmatpush3.bf16.msra.mxu0 %v1386_v12 }
 0xbd7   :  { %v655_v42 = vpop.f32.mrb[10].mxu0 }
 0xbd8   :  { %v656_v43 = vadd.f32 %v655_v42, %v154_v41  ;;  %v1160_v44 = vpop.f32.mrb[11].mxu0 }
 0xbda   :  { %1283 = vtanh.f32 %v656_v43  ;;  %v1031_v46 = vmul.f32 -1.442695, %v656_v43 }
 0xbdc   :  { %1285 = vpow2.f32 %v1031_v46 }
 0xbe4   :  { %v1284_v45 = vpop.eup %1283 }
 0xbe5   :  { %668 = vrot.lane.b32.xlu0 %v1284_v45, %s1318_s13 }
 0xbe6   :  { %v1286_v47 = vpop.eup %1285 }
 0xbe7   :  { %v662_v48 = vadd.f32 1.0, %v1286_v47  ;;  %v11_v47 = vstv %s1538_s5 }
 0xbe8   :  { %12 = vst [vmem:[#allocation3] sm:$0x1] %v11_v47 }
 0xbe9   :  { %1287 = vrcp.f32 %v662_v48 }
 0xbf3   :  { %v1288_v49 = vpop.eup %1287 }
 0xbf4   :  { %v666_v52 = vmul.f32 %v1288_v49, %v576_v36 }
 0xc57   :  { %v669_v50 = vpop.permute.xlu0 %668 }
 0xc58   :  { %v671_v51 = vmul.f32 %v1288_v49, %v669_v50 }
 0xc5a   :  { %673 = vrot.lane.b32.xlu1 %v671_v51, %s1318_s13 }
 0xccc   :  { %v674_v53 = vpop.permute.xlu1 %673 }
 0xccd   :  { %v676_v54 = vadd.f32 %v674_v53, %v666_v52 }
 0xccf   :  { %1289 = vtanh.f32 %v676_v54 }
 0xcd9   :  { %v1290_v55 = vpop.eup %1289 }
 0xcda   :  { %679 = vrot.lane.b32.xlu0 %v1290_v55, %s1318_s13 }
 0xd4c   :  { %v680_v56 = vpop.permute.xlu0 %679 }
 0xd4d   :  { %v682_v57 = vmul.f32 %v1288_v49, %v680_v56 }
 0xd4f   :  { %685 = vrot.lane.b32.xlu1 %v682_v57, %s1319_s3 }
 0xdc1   :  { %v686_v58 = vpop.permute.xlu1 %685 }
 0xdc2   :  { %1170 = vmatmul.mubr.msk.f32.vlgmr.msra.gmra.mrb[6].mxu1 %vm185_vm2, %v686_v58 }
 0xdc3   :  { %1242 = vmatpush3.bf16.msra.mxu1 %v1373_v8  ;;  %1191 = vmatprep.mubr.msk.f32.mxu1 %vm1316_vm1, %v1317_v4 }
 0xdc4   :  { %1243 = vmatprep.subr.bf16.mxu1 %v1315_v0 }
 0xdc7   :  { %1245 = vmatpush3.bf16.msra.mxu1 %v1386_v12 }
 0xe95   :  { %v755_v63 = vpop.f32.mrb[6].mxu1 }
 0xe96   :  { %v756_v1 = vadd.f32 %v755_v63, %v159_v60  ;;  %v1171_v2 = vpop.f32.mrb[7].mxu1 }
 0xe98   :  { %1291 = vtanh.f32 %v756_v1  ;;  %v1033_v5 = vmul.f32 -1.442695, %v756_v1 }
 0xe9a   :  { %1293 = vpow2.f32 %v1033_v5 }
 0xea2   :  { %v1292_v3 = vpop.eup %1291 }
 0xea3   :  { %768 = vrot.lane.b32.xlu0 %v1292_v3, %s1318_s13 }
 0xea4   :  { %v1294_v8 = vpop.eup %1293 }
 0xea5   :  { %v762_v6 = vadd.f32 1.0, %v1294_v8 }
 0xea7   :  { %1295 = vrcp.f32 %v762_v6 }
 0xeb1   :  { %v1296_v4 = vpop.eup %1295 }
 0xeb2   :  { %v766_v12 = vmul.f32 %v1296_v4, %v676_v54  ;;  %v1039_v54 = vld [vmem:[#allocation3] ss:$0 sm:$0xff] }
 0xf15   :  { %v769_v7 = vpop.permute.xlu0 %768 }
 0xf16   :  { %v771_v0 = vmul.f32 %v1296_v4, %v769_v7 }
 0xf18   :  { %773 = vrot.lane.b32.xlu1 %v771_v0, %s1318_s13 }
 0xf8a   :  { %v774_v9 = vpop.permute.xlu1 %773 }
 0xf8b   :  { %v776_v59 = vadd.f32 %v774_v9, %v766_v12 }
 0xf8d   :  { %1297 = vtanh.f32 %v776_v59 }
 0xf97   :  { %v1298_v10 = vpop.eup %1297 }
 0xf98   :  { %779 = vrot.lane.b32.xlu0 %v1298_v10, %s1318_s13 }
0x100a   :  { %v780_v11 = vpop.permute.xlu0 %779 }
0x100b   :  { %v782_v14 = vmul.f32 %v1296_v4, %v780_v11 }
0x100d   :  { %785 = vrot.lane.b32.xlu1 %v782_v14, %s1319_s3 }
0x107f   :  { %v786_v15 = vpop.permute.xlu1 %785 }
0x1080   :  { %1181 = vmatmul.mubr.msk.f32.vlgmr.msra.gmra.mrb[12].mxu0 %vm185_vm2, %v786_v15 }
0x1153   :  { %v855_v17 = vpop.f32.mrb[12].mxu0 }
0x1154   :  { %v856_v18 = vadd.f32 %v855_v17, %v164_v16  ;;  %v1182_v19 = vpop.f32.mrb[13].mxu0 }
0x1156   :  { %1299 = vtanh.f32 %v856_v18  ;;  %v1035_v21 = vmul.f32 -1.442695, %v856_v18 }
0x1158   :  { %1301 = vpow2.f32 %v1035_v21 }
0x1160   :  { %v1300_v20 = vpop.eup %1299 }
0x1161   :  { %868 = vrot.lane.b32.xlu0 %v1300_v20, %s1318_s13 }
0x1162   :  { %v1302_v22 = vpop.eup %1301 }
0x1163   :  { %v862_v23 = vadd.f32 1.0, %v1302_v22 }
0x1165   :  { %1303 = vrcp.f32 %v862_v23 }
0x116f   :  { %v1304_v24 = vpop.eup %1303 }
0x1170   :  { %v866_v27 = vmul.f32 %v1304_v24, %v776_v59 }
0x11d3   :  { %v869_v25 = vpop.permute.xlu0 %868 }
0x11d4   :  { %v871_v26 = vmul.f32 %v1304_v24, %v869_v25 }
0x11d6   :  { %873 = vrot.lane.b32.xlu1 %v871_v26, %s1318_s13 }
0x1248   :  { %v874_v28 = vpop.permute.xlu1 %873 }
0x1249   :  { %v876_v62 = vadd.f32 %v874_v28, %v866_v27 }
0x124b   :  { %1305 = vtanh.f32 %v876_v62 }
0x1255   :  { %v1306_v29 = vpop.eup %1305 }
0x1256   :  { %879 = vrot.lane.b32.xlu0 %v1306_v29, %s1318_s13 }
0x12c8   :  { %v880_v30 = vpop.permute.xlu0 %879 }
0x12c9   :  { %v882_v31 = vmul.f32 %v1304_v24, %v880_v30 }
0x12cb   :  { %885 = vrot.lane.b32.xlu1 %v882_v31, %s1319_s3 }
0x133d   :  { %v886_v32 = vpop.permute.xlu1 %885 }
0x133e   :  { %1192 = vmatmul.mubr.msk.f32.vlgmr.msra.gmra.mrb[8].mxu1 %vm185_vm2, %v886_v32 }
0x1411   :  { %v955_v34 = vpop.f32.mrb[8].mxu1 }
0x1412   :  { %v956_v35 = vadd.f32 %v955_v34, %v169_v33  ;;  %v1193_v36 = vpop.f32.mrb[9].mxu1 }
0x1414   :  { %1307 = vtanh.f32 %v956_v35  ;;  %v1037_v38 = vmul.f32 -1.442695, %v956_v35 }
0x1416   :  { %1309 = vpow2.f32 %v1037_v38 }
0x141e   :  { %v1308_v37 = vpop.eup %1307 }
0x141f   :  { %968 = vrot.lane.b32.xlu0 %v1308_v37, %s1318_s13 }
0x1420   :  { %v1310_v39 = vpop.eup %1309 }
0x1421   :  { %v962_v40 = vadd.f32 1.0, %v1310_v39 }
0x1423   :  { %1311 = vrcp.f32 %v962_v40 }
0x142d   :  { %v1312_v41 = vpop.eup %1311 }
0x142e   :  { %v966_v61 = vmul.f32 %v1312_v41, %v876_v62 }
0x1491   :  { %v969_v42 = vpop.permute.xlu0 %968 }
0x1492   :  { %v971_v43 = vmul.f32 %v1312_v41, %v969_v42 }
0x1494   :  { %973 = vrot.lane.b32.xlu1 %v971_v43, %s1318_s13 }
0x1498   :  { %989 = vrot.lane.b32.xlu1 %v1038_v13, %s1319_s3 }
0x1506   :  { %v974_v44 = vpop.permute.xlu1 %973 }
0x1507   :  { %v976_v45 = vadd.f32 %v974_v44, %v966_v61 }
0x1509   :  { %1313 = vtanh.f32 %v976_v45 }
0x150a   :  { %v990_v49 = vpop.permute.xlu1 %989 }
0x1513   :  { %v1314_v46 = vpop.eup %1313 }
0x1514   :  { %979 = vrot.lane.b32.xlu0 %v1314_v46, %s1318_s13 }
0x1586   :  { %v980_v48 = vpop.permute.xlu0 %979 }
0x1587   :  { %v982_v50 = vmul.f32 %v1312_v41, %v980_v48 }
0x1589   :  { %v992_v51 = vmul.f32 %v990_v49, %v982_v50 }
0x158b   :  { %994 = vrot.lane.b32.xlu0 %v992_v51, %s1319_s3 }
0x15fd   :  { %v995_v52 = vpop.permute.xlu0 %994 }
0x15fe   :  { %v997_v53 = vsel %vm185_vm2, %v995_v52, 0.0 }
0x15ff   :  { %998 = vadd.xlane.f32.xlu1 %v997_v53 }
0x168c   :  { %v999_v55 = vpop.xlane.xlu1 %998 }
0x168d   :  { %v1007_v56 = vadd.f32 %v1039_v54, %v999_v55 }
0x168f   :  { %1009 = vst.msk [vmem:[%s1539_s6] sm:$0xff] %vm1008_vm3, %v1007_v56 }

</bundles_post_ra>
